<compile_context>
chip_gen: v6e
topology: v6e:2x2x1
jax: 0.10.0
libtpu: 0.0.40
codegen_flags: <defaults>
</compile_context>

<pallas_src>
import jax
import jax.numpy as jnp
import numpy as np
from jax import lax
from jax.experimental import pallas as pl
from jax.experimental.pallas import tpu as pltpu

# ---- problem sizes (small, consistent with the module) ----------------------
BATCH = 8        # batch size
D_IN = 16        # input_dim
H1 = 64          # first hidden width
H2 = 64          # second hidden width

PREC = lax.Precision.HIGHEST   # see header note; DEFAULT is fine at ~1e-3 tol


def fnn_kernel(x_ref, w1_ref, w2_ref, w3_ref, b12_ref, b3_ref, o_ref):
    """Whole batch in one (grid-less) invocation.

    x_ref   : (N, D_IN)      input rows                     (VMEM)
    w1_ref  : (D_IN, H1)     Linear1 weight, pre-transposed (VMEM)
    w2_ref  : (H1, H2)       Linear2 weight, pre-transposed (VMEM)
    w3_ref  : (1, H2)        Linear3 weight, row vector     (VMEM)
    b12_ref : (2, H1)        row 0 = bias1, row 1 = bias2   (VMEM)
    b3_ref  : (1, 1)         Linear3 bias (true scalar)     (SMEM)
    o_ref   : (N, 1)         per-row regression output      (VMEM)
    """
    x = x_ref[...]                                            # (N, D_IN)
    b12 = b12_ref[...]                                        # (2, H1)

    # Linear(D_IN -> H1) + ReLU
    h1 = jnp.dot(x, w1_ref[...],
                 preferred_element_type=jnp.float32, precision=PREC)
    h1 = jnp.maximum(h1 + b12[0:1, :], 0.0)                   # (N, H1)

    # Linear(H1 -> H2) + ReLU
    h2 = jnp.dot(h1, w2_ref[...],
                 preferred_element_type=jnp.float32, precision=PREC)
    h2 = jnp.maximum(h2 + b12[1:2, :], 0.0)                   # (N, H2)

    # Linear(H2 -> 1): VPU multiply + XLU lane reduction (keeps the MXU free
    # of a degenerate one-column matmul).
    out = jnp.sum(h2 * w3_ref[...], axis=-1, keepdims=True)   # (N, 1)
    o_ref[...] = out + b3_ref[0, 0]


def prepare_params(params):
    """One-time relayout of PyTorch-style params into kernel layout.

    Done once (outside the hot path) so each forward call's HLO contains only
    the pallas_call, with no per-call transpose/stack/reshape ops.
    """
    w1, b1, w2, b2, w3, b3 = params
    w1_k = jnp.asarray(w1).T                        # (D_IN, H1)
    w2_k = jnp.asarray(w2).T                        # (H1, H2)
    w3_k = jnp.asarray(w3).reshape(1, H2)           # (1, H2)
    b12_k = jnp.stack([jnp.asarray(b1), jnp.asarray(b2)], axis=0)  # (2, H1)
    b3_k = jnp.asarray(b3).reshape(1, 1)            # (1, 1) scalar, SMEM-bound
    return (w1_k, w2_k, w3_k, b12_k, b3_k)


def fnn_forward(x, kernel_params):
    """x: (N, D_IN) float32, kernel_params from prepare_params().
    Returns (N,) float32, matching .flatten() of the PyTorch module."""
    w1_k, w2_k, w3_k, b12_k, b3_k = kernel_params
    n, _ = x.shape

    out = pl.pallas_call(
        fnn_kernel,
        out_shape=jax.ShapeDtypeStruct((n, 1), jnp.float32),
        in_specs=[
            pl.BlockSpec(memory_space=pltpu.MemorySpace.VMEM),   # x
            pl.BlockSpec(memory_space=pltpu.MemorySpace.VMEM),   # w1
            pl.BlockSpec(memory_space=pltpu.MemorySpace.VMEM),   # w2
            pl.BlockSpec(memory_space=pltpu.MemorySpace.VMEM),   # w3
            pl.BlockSpec(memory_space=pltpu.MemorySpace.VMEM),   # b12
            pl.BlockSpec(memory_space=pltpu.MemorySpace.SMEM),   # b3 scalar
        ],
        out_specs=pl.BlockSpec(memory_space=pltpu.MemorySpace.VMEM),
    )(x, w1_k, w2_k, w3_k, b12_k, b3_k)

    return out.reshape(-1)   # matches .flatten() of (N, 1)


fnn_forward_jit = jax.jit(fnn_forward)


def ref_forward(x, params):
    """Pure-JAX reference with identical math (PyTorch-layout params)."""
    w1, b1, w2, b2, w3, b3 = params
    h1 = jnp.maximum(jnp.dot(x, w1.T, precision=PREC) + b1, 0.0)
    h2 = jnp.maximum(jnp.dot(h1, w2.T, precision=PREC) + b2, 0.0)
    out = jnp.dot(h2, w3.T, precision=PREC) + b3
    return out.reshape(-1)


def init_params(key):
    ks = jax.random.split(key, 6)
    w1 = 0.1 * jax.random.normal(ks[0], (H1, D_IN), jnp.float32)
    b1 = 0.1 * jax.random.normal(ks[1], (H1,), jnp.float32)
    w2 = 0.1 * jax.random.normal(ks[2], (H2, H1), jnp.float32)
    b2 = 0.1 * jax.random.normal(ks[3], (H2,), jnp.float32)
    w3 = 0.1 * jax.random.normal(ks[4], (1, H2), jnp.float32)
    b3 = 0.1 * jax.random.normal(ks[5], (1,), jnp.float32)
    return (w1, b1, w2, b2, w3, b3)


if __name__ == "__main__":
    key = jax.random.PRNGKey(0)
    kx, kp = jax.random.split(key)
    x = jax.random.normal(kx, (BATCH, D_IN), jnp.float32)
    params = init_params(kp)

    # One-time relayout to kernel layout (amortized out of the hot path).
    kernel_params = prepare_params(params)

    out = jax.block_until_ready(fnn_forward_jit(x, kernel_params))
    ref = jax.block_until_ready(ref_forward(x, params))

    assert out.shape == (BATCH,), out.shape
    np.testing.assert_allclose(np.asarray(out), np.asarray(ref),
                               rtol=1e-4, atol=1e-4)
    print("KERNEL_OK")
</pallas_src>

<mosaic_0001>
module attributes {stable_mosaic.version = 11 : i64} {
  func.func @fnn_kernel(%arg0: memref<8x16xf32, #tpu.memory_space<vmem>>, %arg1: memref<16x64xf32, #tpu.memory_space<vmem>>, %arg2: memref<64x64xf32, #tpu.memory_space<vmem>>, %arg3: memref<1x64xf32, #tpu.memory_space<vmem>>, %arg4: memref<2x64xf32, #tpu.memory_space<vmem>>, %arg5: memref<1x1xf32, #tpu.memory_space<smem>>, %arg6: memref<8x1xf32, #tpu.memory_space<vmem>>) attributes {dimension_semantics = [], scalar_prefetch = 0 : i64, scratch_operands = 0 : i64, tpu.core_type = #tpu.core_type<tc>} {
    %c0 = arith.constant 0 : index
    %c0_0 = arith.constant 0 : index
    %0 = vector.load %arg0[%c0, %c0_0] : memref<8x16xf32, #tpu.memory_space<vmem>>, vector<8x16xf32>
    %c0_1 = arith.constant 0 : index
    %c0_2 = arith.constant 0 : index
    %1 = vector.load %arg4[%c0_1, %c0_2] : memref<2x64xf32, #tpu.memory_space<vmem>>, vector<2x64xf32>
    %c0_3 = arith.constant 0 : index
    %c0_4 = arith.constant 0 : index
    %2 = vector.load %arg1[%c0_3, %c0_4] : memref<16x64xf32, #tpu.memory_space<vmem>>, vector<16x64xf32>
    %cst = arith.constant dense<0.000000e+00> : vector<8x64xf32>
    %3 = tpu.matmul %0, %2, %cst {dimension_numbers = #tpu.dot_dimension_numbers<[1], [0], [0], [1], [0, 0, 1, 1], [], []>, precision = #tpu.contract_precision<fp32>} : vector<8x16xf32>, vector<16x64xf32>, vector<8x64xf32> -> vector<8x64xf32>
    %4 = vector.extract_strided_slice %1 {offsets = [0, 0], sizes = [1, 64], strides = [1, 1]} : vector<2x64xf32> to vector<1x64xf32>
    %5 = vector.broadcast %4 : vector<1x64xf32> to vector<8x64xf32>
    %6 = arith.addf %3, %5 : vector<8x64xf32>
    %cst_5 = arith.constant 0.000000e+00 : f32
    %7 = vector.broadcast %cst_5 : f32 to vector<8x64xf32>
    %8 = arith.maximumf %6, %7 : vector<8x64xf32>
    %c0_6 = arith.constant 0 : index
    %c0_7 = arith.constant 0 : index
    %9 = vector.load %arg2[%c0_6, %c0_7] : memref<64x64xf32, #tpu.memory_space<vmem>>, vector<64x64xf32>
    %cst_8 = arith.constant dense<0.000000e+00> : vector<8x64xf32>
    %10 = tpu.matmul %8, %9, %cst_8 {dimension_numbers = #tpu.dot_dimension_numbers<[1], [0], [0], [1], [0, 0, 1, 1], [], []>, precision = #tpu.contract_precision<fp32>} : vector<8x64xf32>, vector<64x64xf32>, vector<8x64xf32> -> vector<8x64xf32>
    %11 = vector.extract_strided_slice %1 {offsets = [1, 0], sizes = [1, 64], strides = [1, 1]} : vector<2x64xf32> to vector<1x64xf32>
    %12 = vector.broadcast %11 : vector<1x64xf32> to vector<8x64xf32>
    %13 = arith.addf %10, %12 : vector<8x64xf32>
    %cst_9 = arith.constant 0.000000e+00 : f32
    %14 = vector.broadcast %cst_9 : f32 to vector<8x64xf32>
    %15 = arith.maximumf %13, %14 : vector<8x64xf32>
    %c0_10 = arith.constant 0 : index
    %c0_11 = arith.constant 0 : index
    %16 = vector.load %arg3[%c0_10, %c0_11] : memref<1x64xf32, #tpu.memory_space<vmem>>, vector<1x64xf32>
    %17 = vector.broadcast %16 : vector<1x64xf32> to vector<8x64xf32>
    %18 = arith.mulf %15, %17 : vector<8x64xf32>
    %cst_12 = arith.constant dense<0.000000e+00> : vector<8xf32>
    %19 = vector.multi_reduction <add>, %18, %cst_12 [1] : vector<8x64xf32> to vector<8xf32>
    %20 = vector.shape_cast %19 : vector<8xf32> to vector<8x1xf32>
    %c0_13 = arith.constant 0 : index
    %c0_14 = arith.constant 0 : index
    %21 = memref.load %arg5[%c0_13, %c0_14] : memref<1x1xf32, #tpu.memory_space<smem>>
    %22 = vector.broadcast %21 : f32 to vector<8x1xf32>
    %23 = arith.addf %20, %22 : vector<8x1xf32>
    %c0_15 = arith.constant 0 : index
    %c0_16 = arith.constant 0 : index
    %24 = vector.load %arg6[%c0_15, %c0_16] : memref<8x1xf32, #tpu.memory_space<vmem>>, vector<8x1xf32>
    tpu.vector_store %arg6[%c0_15, %c0_16], %23 {strides = array<i32>} : memref<8x1xf32, #tpu.memory_space<vmem>>, vector<8x1xf32>,
    return
  }
}

</mosaic_0001>

<bundles_post_ra>
// kernel: fnn_forward.1
= control target key start
LH: loop header
LB: loop body
LE: loop exit
PB: predicated region body
PF: predicated region fallthrough
CT: control target
= control target key end

     0   :  { %12 = vsyncpa [#allocation4], 0  ;;  %s1694_s0 = inlined_call_operand.hbm [shape: f32[8,16], index: 0, kind: input, shape index: {}]   ;;  %s1695_s1 = inlined_call_operand.hbm [shape: f32[16,64], index: 1, kind: input, shape index: {}]   ;;  %s1696_s2 = inlined_call_operand.hbm [shape: f32[64,64], index: 2, kind: input, shape index: {}]   ;;  %s1697_s3 = inlined_call_operand.vmem [shape: f32[1,64], index: 3, kind: input, shape index: {}]   ;;  %s1698_s4 = inlined_call_operand.vmem [shape: f32[2,64], index: 4, kind: input, shape index: {}]   ;;  %s1699_s5 = inlined_call_operand.<no memory space> [shape: f32[1,1], index: 5, kind: input, shape index: {}]   ;;  %s1700_s6 = inlined_call_operand.vmem [shape: f32[8,1], index: 6, kind: output, shape index: {}]  }
   0x1   :  { %13 = vsyncpa [#allocation6], 0  ;;  %s1411_s21 = smov [#allocation5]  }
   0x2   :  { %s29_s22 = sshll.u32 %s1411_s21, 4  ;;  %s30_s22 = int_to_ptr.vmem [resolvable:$true] %s29_s22 }
   0x3   :  { %s1355_s23 = scalar_lea.vmem %s30_s22, 256  ;;  %p1360_p1 = scmp.lt.s32.totalorder %s30_s22, %s30_s22 }
   0x4   :  { %p1356_p0 = scmp.ne.s32.totalorder %s30_s22, %s1355_s23  ;;  %p1361_p2 = scmp.lt.s32.totalorder %s1355_s23, %s1355_s23 }
   0x6   :  { %p1362_p3 = por %p1361_p2, %p1360_p1 }
   0x8   :  { %p1363_p4 = pnand %p1362_p3, %p1356_p0 }
   0xa   :  { %1366 = shalt.err (!%p1363_p4)
}
   0xb   :  { %s1412_s24 = smov 128   ;;  %s1413_s25 = smov 8  }
   0xc   :  { %35 = dma.hbm_to_vmem [thread:$0]  %s1695_s1, 256, %s30_s22, [#allocation6], %s1412_s24, %s1412_s24, %s1413_s25  }
   0xd   :  { %s1414_s28 = smov [#allocation3]   ;;  %s1415_s30 = smov [#allocation7]  }
   0xe   :  { %s20_s29 = sshll.u32 %s1414_s28, 4  ;;  %s41_s7 = sshll.u32 %s1415_s30, 4  ;;  %s21_s29 = int_to_ptr.vmem [resolvable:$true] %s20_s29  ;;  %s42_s7 = int_to_ptr.vmem [resolvable:$true] %s41_s7 }
   0xf   :  { %s1375_s8 = scalar_lea.vmem %s21_s29, 128  ;;  %p1380_p6 = scmp.lt.s32.totalorder %s21_s29, %s21_s29 }
  0x10   :  { %p1376_p5 = scmp.ne.s32.totalorder %s21_s29, %s1375_s8  ;;  %p1381_p7 = scmp.lt.s32.totalorder %s1375_s8, %s1375_s8 }
  0x12   :  { %p1382_p8 = por %p1381_p7, %p1380_p6 }
  0x14   :  { %p1383_p9 = pnand %p1382_p8, %p1376_p5 }
  0x16   :  { %1386 = shalt.err (!%p1383_p9)
}
  0x17   :  { %23 = dma.hbm_to_vmem [thread:$0]  %s1694_s0, 128, %s21_s29, [#allocation4]  }
  0x18   :  { %s1395_s11 = scalar_lea.vmem %s42_s7, 1024  ;;  %p1400_p11 = scmp.lt.s32.totalorder %s42_s7, %s42_s7 }
  0x19   :  { %p1396_p10 = scmp.ne.s32.totalorder %s42_s7, %s1395_s11  ;;  %p1401_p12 = scmp.lt.s32.totalorder %s1395_s11, %s1395_s11 }
  0x1b   :  { %p1402_p13 = por %p1401_p12, %p1400_p11 }
  0x1d   :  { %p1403_p0 = pnand %p1402_p13, %p1396_p10 }
  0x1f   :  { %1406 = shalt.err (!%p1403_p0)
}
  0x20   :  { %47 = dma.hbm_to_vmem [thread:$0]  %s1696_s2, 1024, %s42_s7, [#allocation6], %s1412_s24, %s1412_s24, %s1413_s25  }
  0x21   :  { %1407 = dma.done.wait [#allocation4], 128  }
  0x22   :  { %1408 = vsyncadd [#allocation4], 4294967168 }
  0x23   :  { %1409 = dma.done.wait [#allocation6], 1280  }
  0x24   :  { %1410 = vsyncadd [#allocation6], 4294966016  ;;  %v1416_v0 = vmov 0.0   ;;  %vm1417_vm0 = vmmov 0   ;;  %vm71_vm1 = vcmask 130048   ;;  %v66_v1 = vld [vmem:[#allocation5 + $0x8] sm:$0xff] }
  0x25   :  { %1184 = vmatprep.subr.mxu0 %v1416_v0  ;;  %1191 = vmatprep.subr.mxu1 %v1416_v0  ;;  %v65_v2 = vld [vmem:[#allocation5] sm:$0xff]  ;;  %v63_v3 = vld [vmem:[#allocation3] sm:$0xff]  ;;  %v104_v4 = vand.u32 4294901760, %v66_v1  ;;  %v542_v20 = vld [vmem:[#allocation7 + $0x38] sm:$0xff]  ;;  %vm547_vm2 = vcmask 523264   ;;  %vm1103_vm3 = vcmask 7168  }
  0x26   :  { %1188 = vmatprep.mubr.msk.f32.mxu0 %vm1417_vm0, %v1416_v0  ;;  %1195 = vmatprep.mubr.msk.f32.mxu1 %vm1417_vm0, %v1416_v0  ;;  %v107_v5 = vand.u32 4294901760, %v65_v2  ;;  %v73_v6 = vsel %vm71_vm1, %v63_v3, 0  ;;  %v1492_v21 = vand.u32 4294901760, %v542_v20  ;;  %v541_v22 = vld [vmem:[#allocation7 + $0x30] sm:$0xff]  ;;  %v540_v25 = vld [vmem:[#allocation7 + $0x28] sm:$0xff]  ;;  %v539_v29 = vld [vmem:[#allocation7 + $0x20] sm:$0xff] }
  0x27   :  { %v142_v7 = vand.u32 4294901760, %v73_v6  ;;  %1185 = vmatpush3.msra.mxu0 %v104_v4  ;;  %v182_v8 = vsub.f32 %v66_v1, %v104_v4  ;;  %v1497_v24 = vand.u32 4294901760, %v541_v22  ;;  %v1505_v28 = vand.u32 4294901760, %v540_v25  ;;  %v538_v34 = vld [vmem:[#allocation7 + $0x18] sm:$0xff]  ;;  %v537_v40 = vld [vmem:[#allocation7 + $0x10] sm:$0xff]  ;;  %v536_v46 = vld [vmem:[#allocation7 + $0x8] sm:$0xff] }
  0x28   :  { %v189_v9 = vsub.f32 %v65_v2, %v107_v5  ;;  %1186 = vmatprep.subr.mxu0 %v1416_v0  ;;  %v1495_v23 = vsub.f32 %v542_v20, %v1492_v21  ;;  %v1516_v33 = vand.u32 4294901760, %v539_v29  ;;  %v1528_v39 = vand.u32 4294901760, %v538_v34  ;;  %v535_v52 = vld [vmem:[#allocation7] sm:$0xff] }
  0x29   :  { %v143_v10 = vsub.f32 %v73_v6, %v142_v7  ;;  %1187 = vmatpush3.msra.mxu0 %v107_v5  ;;  %v183_v11 = vand.u32 4294901760, %v182_v8  ;;  %v1503_v27 = vsub.f32 %v541_v22, %v1497_v24  ;;  %v1514_v32 = vsub.f32 %v540_v25, %v1505_v28 }
  0x2a   :  { %v190_v12 = vand.u32 4294901760, %v189_v9  ;;  %1198 = vmatprep.subr.mxu0 %v1416_v0  ;;  %v653_v26 = vand.u32 4294901760, %v1495_v23  ;;  %v1525_v38 = vsub.f32 %v539_v29, %v1516_v33  ;;  %v1535_v44 = vand.u32 4294901760, %v537_v40 }
  0x2b   :  { %v144_v13 = vand.u32 4294901760, %v143_v10  ;;  %v184_v14 = vsub.f32 %v182_v8, %v183_v11  ;;  %v660_v31 = vand.u32 4294901760, %v1503_v27  ;;  %v667_v37 = vand.u32 4294901760, %v1514_v32 }
  0x2c   :  { %v191_v15 = vsub.f32 %v189_v9, %v190_v12  ;;  %v654_v30 = vsub.f32 %v1495_v23, %v653_v26  ;;  %v674_v43 = vand.u32 4294901760, %v1525_v38  ;;  %v1539_v45 = vsub.f32 %v538_v34, %v1528_v39 }
  0x2d   :  { %v145_v16 = vsub.f32 %v143_v10, %v144_v13  ;;  %v185_v17 = vand.u32 4294901760, %v184_v14  ;;  %v661_v36 = vsub.f32 %v1503_v27, %v660_v31  ;;  %v668_v42 = vsub.f32 %v1514_v32, %v667_v37 }
  0x2e   :  { %v192_v18 = vand.u32 4294901760, %v191_v15  ;;  %v655_v35 = vand.u32 4294901760, %v654_v30  ;;  %v675_v48 = vsub.f32 %v1525_v38, %v674_v43  ;;  %v1546_v49 = vsub.f32 %v537_v40, %v1535_v44 }
  0x2f   :  { %v146_v19 = vand.u32 4294901760, %v145_v16  ;;  %1192 = vmatpush3.msra.mxu1 %v185_v17  ;;  %v662_v41 = vand.u32 4294901760, %v661_v36  ;;  %v669_v47 = vand.u32 4294901760, %v668_v42  ;;  %v1548_v50 = vand.u32 4294901760, %v536_v46 }
  0x30   :  { %1193 = vmatprep.subr.mxu1 %v1416_v0  ;;  %v681_v51 = vand.u32 4294901760, %v1539_v45  ;;  %v676_v53 = vand.u32 4294901760, %v675_v48  ;;  %v688_v54 = vand.u32 4294901760, %v1546_v49  ;;  %v1558_v56 = vand.u32 4294901760, %v535_v52 }
  0x31   :  { %1189 = vmatmul.mubr.f32.vlgmr.msra.gmra.mxu0 %v146_v19  ;;  %1194 = vmatpush3.msra.mxu1 %v192_v18  ;;  %v1556_v55 = vsub.f32 %v536_v46, %v1548_v50 }
  0x32   :  { %1199 = vmatpush3.msra.mxu0 %v182_v8  ;;  %1196 = vmatmul.mubr.f32.vlgmr.msra.gmra.mxu1 %v142_v7  ;;  %v682_v57 = vsub.f32 %v1539_v45, %v681_v51  ;;  %v689_v58 = vsub.f32 %v1546_v49, %v688_v54  ;;  %v1571_v60 = vsub.f32 %v535_v52, %v1558_v56  ;;  %v1594_v8 = vld [vmem:[%s1698_s4] sm:$0x3] }
  0x33   :  { %1200 = vmatprep.subr.mxu0 %v1416_v0  ;;  %1205 = vmatprep.subr.mxu1 %v1416_v0  ;;  %v695_v59 = vand.u32 4294901760, %v1556_v55 }
  0x34   :  { %1201 = vmatpush3.msra.mxu0 %v189_v9  ;;  %1202 = vmatprep.mubr.msk.f32.mxu0 %vm1417_vm0, %v1416_v0  ;;  %v683_v61 = vand.u32 4294901760, %v682_v57  ;;  %v690_v62 = vand.u32 4294901760, %v689_v58  ;;  %v702_v1 = vand.u32 4294901760, %v1571_v60  ;;  %v1101_v58 = vstv %s1699_s5 }
  0x35   :  { %1206 = vmatpush3.msra.mxu1 %v104_v4  ;;  %1203 = vmatmul.mubr.f32.vlgmr.msra.gmra.mxu0 %v143_v10  ;;  %v696_v63 = vsub.f32 %v1556_v55, %v695_v59 }
  0x36   :  { %1207 = vmatprep.subr.mxu1 %v1416_v0  ;;  %1212 = vmatprep.subr.mxu0 %v1416_v0  ;;  %v703_v3 = vsub.f32 %v1571_v60, %v702_v1 }
  0x37   :  { %1208 = vmatpush3.msra.mxu1 %v107_v5  ;;  %1209 = vmatprep.mubr.msk.f32.mxu1 %vm1417_vm0, %v1416_v0  ;;  %v697_v2 = vand.u32 4294901760, %v696_v63 }
  0x38   :  { %1213 = vmatpush3.msra.mxu0 %v183_v11  ;;  %1210 = vmatmul.mubr.f32.vlgmr.msra.gmra.mxu1 %v144_v13 }
  0x39   :  { %1214 = vmatprep.subr.mxu0 %v1416_v0  ;;  %1219 = vmatprep.subr.mxu1 %v1416_v0 }
  0x3a   :  { %1215 = vmatpush3.msra.mxu0 %v190_v12  ;;  %1216 = vmatprep.mubr.msk.f32.mxu0 %vm1417_vm0, %v1416_v0 }
  0x3b   :  { %1220 = vmatpush3.msra.mxu1 %v104_v4  ;;  %1217 = vmatmul.mubr.f32.vlgmr.msra.gmra.mxu0 %v142_v7  ;;  %v704_v4 = vand.u32 4294901760, %v703_v3 }
  0x3c   :  { %1221 = vmatprep.subr.mxu1 %v1416_v0  ;;  %1223 = vmatprep.mubr.msk.f32.mxu1 %vm1417_vm0, %v1416_v0 }
  0x3d   :  { %1222 = vmatpush3.msra.mxu1 %v107_v5  ;;  %1226 = vmatprep.subr.mxu0 %v1416_v0  ;;  %v67_v5 = vlaneseq }
  0x3e   :  { %1224 = vmatmul.mubr.f32.vlgmr.msra.gmra.mxu1 %v142_v7  ;;  %1245 = vmatprep.subr.mxu1 %v1416_v0 }
  0x3f   :  { %1261 = vmatprep.mubr.msk.f32.mxu1 %vm1417_vm0, %v1416_v0  ;;  %1242 = vmatprep.mubr.msk.f32.mxu0 %vm1417_vm0, %v1416_v0  ;;  %v1588_v6 = vshrl.u32 %v67_v5, 7 }
  0x40   :  { %1227 = vmatpush3.msra.mxu0 %v1492_v21  ;;  %1246 = vmatpush3.msra.mxu1 %v655_v35 }
  0x41   :  { %1228 = vmatprep.subr.mxu0 %v1416_v0  ;;  %1247 = vmatprep.subr.mxu1 %v1416_v0  ;;  %v69_v7 = vsub.s32 0, %v1588_v6 }
  0x42   :  { %1229 = vmatpush3.msra.mxu0 %v1497_v24  ;;  %1248 = vmatpush3.msra.mxu1 %v662_v41 }
  0x43   :  { %1230 = vmatprep.subr.mxu0 %v1416_v0  ;;  %1249 = vmatprep.subr.mxu1 %v1416_v0  ;;  %v70_v9 = vrot.slane %v1594_v8, %v69_v7 }
  0x44   :  { %1231 = vmatpush3.msra.mxu0 %v1505_v28  ;;  %1250 = vmatpush3.msra.mxu1 %v669_v47 }
  0x45   :  { %1232 = vmatprep.subr.mxu0 %v1416_v0  ;;  %1251 = vmatprep.subr.mxu1 %v1416_v0 }
  0x46   :  { %1233 = vmatpush3.msra.mxu0 %v1516_v33  ;;  %1252 = vmatpush3.msra.mxu1 %v676_v53 }
  0x47   :  { %1234 = vmatprep.subr.mxu0 %v1416_v0  ;;  %1253 = vmatprep.subr.mxu1 %v1416_v0 }
  0x48   :  { %1235 = vmatpush3.msra.mxu0 %v1528_v39  ;;  %1254 = vmatpush3.msra.mxu1 %v683_v61 }
  0x49   :  { %1236 = vmatprep.subr.mxu0 %v1416_v0  ;;  %1255 = vmatprep.subr.mxu1 %v1416_v0 }
  0x4a   :  { %1237 = vmatpush3.msra.mxu0 %v1535_v44  ;;  %1256 = vmatpush3.msra.mxu1 %v690_v62 }
  0x4b   :  { %1238 = vmatprep.subr.mxu0 %v1416_v0  ;;  %1257 = vmatprep.subr.mxu1 %v1416_v0 }
  0x4c   :  { %1239 = vmatpush3.msra.mxu0 %v1548_v50  ;;  %1258 = vmatpush3.msra.mxu1 %v697_v2 }
  0x4d   :  { %1240 = vmatprep.subr.mxu0 %v1416_v0  ;;  %1259 = vmatprep.subr.mxu1 %v1416_v0 }
  0x4e   :  { %1241 = vmatpush3.msra.mxu0 %v1558_v56  ;;  %1260 = vmatpush3.msra.mxu1 %v704_v4 }
  0x4f   :  { %1264 = vmatprep.subr.mxu0 %v1416_v0  ;;  %1283 = vmatprep.subr.mxu1 %v1416_v0 }
  0xf1   :  { %v148_v10 = vpop.f32.mrf.mxu0 }
  0xf2   :  { %v149_v11 = vadd.f32 %v148_v10, %v70_v9  ;;  %v229_v13 = vpop.f32.mrf.mxu1 }
  0xf3   :  { %v1190_v12 = vpop.f32.mrf.mxu0 }
  0xf4   :  { %v230_v14 = vadd.f32 %v229_v13, %v149_v11  ;;  %v1197_v15 = vpop.f32.mrf.mxu1 }
  0xf5   :  { %v305_v16 = vpop.f32.mrf.mxu0 }
  0xf6   :  { %v306_v17 = vadd.f32 %v305_v16, %v230_v14 }
  0xf7   :  { %v1204_v18 = vpop.f32.mrf.mxu0 }
  0xf8   :  { %v380_v19 = vpop.f32.mrf.mxu1 }
  0xf9   :  { %v381_v20 = vadd.f32 %v380_v19, %v306_v17 }
  0xfa   :  { %v1211_v22 = vpop.f32.mrf.mxu1 }
  0xfb   :  { %v457_v25 = vpop.f32.mrf.mxu0 }
  0xfc   :  { %v458_v29 = vadd.f32 %v457_v25, %v381_v20 }
  0xfd   :  { %v1218_v30 = vpop.f32.mrf.mxu0 }
  0xfe   :  { %v530_v34 = vpop.f32.mrf.mxu1 }
  0xff   :  { %v531_v35 = vadd.f32 %v530_v34, %v458_v29 }
 0x100   :  { %v1225_v36 = vpop.f32.mrf.mxu1 }
 0x101   :  { %v534_v40 = vmax.f32 %v531_v35, 0.0 }
 0x103   :  { %v549_v41 = vsel %vm547_vm2, %v534_v40, 0 }
 0x104   :  { %v1598_v42 = vand.u32 4294901760, %v549_v41 }
 0x106   :  { %v625_v46 = vsub.f32 %v549_v41, %v1598_v42  ;;  %1262 = vmatmul.mubr.f32.vlgmr.msra.gmra.mxu1 %v1598_v42 }
 0x107   :  { %1284 = vmatpush3.msra.mxu1 %v1492_v21  ;;  %1299 = vmatprep.mubr.msk.f32.mxu1 %vm1417_vm0, %v1416_v0 }
 0x108   :  { %v626_v47 = vand.u32 4294901760, %v625_v46  ;;  %1285 = vmatprep.subr.mxu1 %v1416_v0 }
 0x109   :  { %1286 = vmatpush3.msra.mxu1 %v1497_v24 }
 0x10a   :  { %1287 = vmatprep.subr.mxu1 %v1416_v0  ;;  %v627_v48 = vsub.f32 %v625_v46, %v626_v47 }
 0x10b   :  { %1288 = vmatpush3.msra.mxu1 %v1505_v28 }
 0x10c   :  { %1289 = vmatprep.subr.mxu1 %v1416_v0  ;;  %v628_v52 = vand.u32 4294901760, %v627_v48 }
 0x10d   :  { %1290 = vmatpush3.msra.mxu1 %v1516_v33 }
 0x10e   :  { %1291 = vmatprep.subr.mxu1 %v1416_v0  ;;  %1243 = vmatmul.mubr.f32.vlgmr.msra.gmra.mxu0 %v628_v52 }
 0x10f   :  { %1265 = vmatpush3.msra.mxu0 %v1495_v23  ;;  %1292 = vmatpush3.msra.mxu1 %v1528_v39 }
 0x110   :  { %1266 = vmatprep.subr.mxu0 %v1416_v0  ;;  %1293 = vmatprep.subr.mxu1 %v1416_v0 }
 0x111   :  { %1267 = vmatpush3.msra.mxu0 %v1503_v27  ;;  %1294 = vmatpush3.msra.mxu1 %v1535_v44 }
 0x112   :  { %1268 = vmatprep.subr.mxu0 %v1416_v0  ;;  %1295 = vmatprep.subr.mxu1 %v1416_v0 }
 0x113   :  { %1269 = vmatpush3.msra.mxu0 %v1514_v32  ;;  %1296 = vmatpush3.msra.mxu1 %v1548_v50 }
 0x114   :  { %1270 = vmatprep.subr.mxu0 %v1416_v0  ;;  %1297 = vmatprep.subr.mxu1 %v1416_v0 }
 0x115   :  { %1271 = vmatpush3.msra.mxu0 %v1525_v38  ;;  %1298 = vmatpush3.msra.mxu1 %v1558_v56 }
 0x116   :  { %1272 = vmatprep.subr.mxu0 %v1416_v0  ;;  %1300 = vmatmul.mubr.f32.vlgmr.msra.gmra.mxu1 %v626_v47 }
 0x117   :  { %1321 = vmatprep.subr.mxu1 %v1416_v0  ;;  %1273 = vmatpush3.msra.mxu0 %v1539_v45 }
 0x118   :  { %1322 = vmatpush3.msra.mxu1 %v1492_v21  ;;  %1274 = vmatprep.subr.mxu0 %v1416_v0 }
 0x119   :  { %1323 = vmatprep.subr.mxu1 %v1416_v0  ;;  %1275 = vmatpush3.msra.mxu0 %v1546_v49 }
 0x11a   :  { %1324 = vmatpush3.msra.mxu1 %v1497_v24  ;;  %1276 = vmatprep.subr.mxu0 %v1416_v0 }
 0x11b   :  { %1325 = vmatprep.subr.mxu1 %v1416_v0  ;;  %1277 = vmatpush3.msra.mxu0 %v1556_v55 }
 0x11c   :  { %1326 = vmatpush3.msra.mxu1 %v1505_v28  ;;  %1278 = vmatprep.subr.mxu0 %v1416_v0 }
 0x11d   :  { %1327 = vmatprep.subr.mxu1 %v1416_v0  ;;  %1279 = vmatpush3.msra.mxu0 %v1571_v60 }
 0x11e   :  { %1280 = vmatprep.mubr.msk.f32.mxu0 %vm1417_vm0, %v1416_v0  ;;  %1328 = vmatpush3.msra.mxu1 %v1516_v33 }
 0x11f   :  { %1281 = vmatmul.mubr.f32.vlgmr.msra.gmra.mxu0 %v625_v46  ;;  %1302 = vmatprep.subr.mxu0 %v1416_v0 }
 0x120   :  { %1329 = vmatprep.subr.mxu1 %v1416_v0  ;;  %1303 = vmatpush3.msra.mxu0 %v653_v26 }
 0x121   :  { %1330 = vmatpush3.msra.mxu1 %v1528_v39  ;;  %1304 = vmatprep.subr.mxu0 %v1416_v0 }
 0x122   :  { %1331 = vmatprep.subr.mxu1 %v1416_v0  ;;  %1305 = vmatpush3.msra.mxu0 %v660_v31  ;;  %v545_v31 = vsub.s32 1, %v1588_v6 }
 0x123   :  { %1332 = vmatpush3.msra.mxu1 %v1535_v44  ;;  %1306 = vmatprep.subr.mxu0 %v1416_v0 }
 0x124   :  { %1333 = vmatprep.subr.mxu1 %v1416_v0  ;;  %1307 = vmatpush3.msra.mxu0 %v667_v37  ;;  %v546_v33 = vrot.slane %v1594_v8, %v545_v31 }
 0x125   :  { %1334 = vmatpush3.msra.mxu1 %v1548_v50  ;;  %1308 = vmatprep.subr.mxu0 %v1416_v0 }
 0x126   :  { %1335 = vmatprep.subr.mxu1 %v1416_v0  ;;  %1309 = vmatpush3.msra.mxu0 %v674_v43 }
 0x127   :  { %1336 = vmatpush3.msra.mxu1 %v1558_v56  ;;  %1337 = vmatprep.mubr.msk.f32.mxu1 %vm1417_vm0, %v1416_v0 }
 0x128   :  { %1310 = vmatprep.subr.mxu0 %v1416_v0  ;;  %1338 = vmatmul.mubr.f32.vlgmr.msra.gmra.mxu1 %v1598_v42 }
 0x129   :  { %1311 = vmatpush3.msra.mxu0 %v681_v51  ;;  %1318 = vmatprep.mubr.msk.f32.mxu0 %vm1417_vm0, %v1416_v0 }
 0x12a   :  { %1312 = vmatprep.subr.mxu0 %v1416_v0 }
 0x12b   :  { %1313 = vmatpush3.msra.mxu0 %v688_v54  ;;  %v1111_v54 = vld [vmem:[%s1697_s3] ss:$0 sm:$0xff] }
 0x12c   :  { %1314 = vmatprep.subr.mxu0 %v1416_v0 }
 0x12d   :  { %1315 = vmatpush3.msra.mxu0 %v695_v59 }
 0x12e   :  { %1316 = vmatprep.subr.mxu0 %v1416_v0 }
 0x12f   :  { %1317 = vmatpush3.msra.mxu0 %v702_v1 }
 0x130   :  { %1319 = vmatmul.mubr.f32.vlgmr.msra.gmra.mxu0 %v1598_v42 }
 0x1c6   :  { %v741_v21 = vpop.f32.mrf.mxu1 }
 0x1c8   :  { %v1263_v23 = vpop.f32.mrf.mxu1 }
 0x1ce   :  { %v630_v24 = vpop.f32.mrf.mxu0 }
 0x1cf   :  { %v631_v38 = vadd.f32 %v630_v24, %v546_v33 }
 0x1d0   :  { %v1244_v26 = vpop.f32.mrf.mxu0 }
 0x1d1   :  { %v742_v0 = vadd.f32 %v741_v21, %v631_v38 }
 0x1d6   :  { %v910_v27 = vpop.f32.mrf.mxu1 }
 0x1d8   :  { %v1301_v28 = vpop.f32.mrf.mxu1 }
 0x1df   :  { %v829_v32 = vpop.f32.mrf.mxu0 }
 0x1e0   :  { %v830_v44 = vadd.f32 %v829_v32, %v742_v0 }
 0x1e1   :  { %v1282_v37 = vpop.f32.mrf.mxu0 }
 0x1e2   :  { %v911_v45 = vadd.f32 %v910_v27, %v830_v44 }
 0x1e8   :  { %v1084_v39 = vpop.f32.mrf.mxu1 }
 0x1ea   :  { %v1339_v43 = vpop.f32.mrf.mxu1 }
 0x1f0   :  { %v1005_v49 = vpop.f32.mrf.mxu0 }
 0x1f1   :  { %v1006_v50 = vadd.f32 %v1005_v49, %v911_v45 }
 0x1f2   :  { %v1320_v51 = vpop.f32.mrf.mxu0 }
 0x1f3   :  { %v1085_v53 = vadd.f32 %v1084_v39, %v1006_v50 }
 0x1f5   :  { %v1088_v55 = vmax.f32 %v1085_v53, 0.0 }
 0x1f7   :  { %v1096_v56 = vmul.f32 %v1111_v54, %v1088_v55 }
 0x1f9   :  { %v1097_v57 = vsel %vm547_vm2, %v1096_v56, 0.0 }
 0x1fa   :  { %1098 = vadd.xlane.f32.xlu0 %v1097_v57 }
 0x283   :  { %v1099_v59 = vpop.xlane.xlu0 %1098 }
 0x284   :  { %v1102_v60 = vadd.f32 %v1101_v58, %v1099_v59 }
 0x286   :  { %1104 = vst.msk [vmem:[%s1700_s6] sm:$0xff] %vm1103_vm3, %v1102_v60 }
 0x287   :  { %1109 = vsyncpa [#allocation4], 1 }
 0x288   :  { %1110 = vsyncpa [#allocation6], 1 }

</bundles_post_ra>
